<compile_context>
chip_gen: v7x
topology: tpu7x:2x2x1
jax: 0.10.0
libtpu: 0.0.40
codegen_flags: <defaults>
</compile_context>

<pallas_src>
import functools

import jax
import jax.numpy as jnp
from jax import lax
from jax.experimental import pallas as pl
from jax.experimental.pallas import tpu as pltpu


def critic_kernel(xs_ref, xa_ref,
                  ws_ref, bs_ref, wa_ref, ba_ref,
                  w2s_ref, w2a_ref, b2_ref,
                  w3_ref, b3_ref, w4_ref, b4_ref,
                  out_ref, *, sub_b, n_sub):
    """One batch tile in transposed layout: every ref has batch on the lane dim."""
    # Weights/biases are VMEM-resident across the whole grid (constant index_map);
    # load them once per grid step, outside the sub-chunk loop.
    ws, bs = ws_ref[...], bs_ref[...]            # (32, S)  bf16, (32, 1) f32
    wa, ba = wa_ref[...], ba_ref[...]            # (16, A)  bf16, (16, 1) f32
    w2s, w2a, b2 = w2s_ref[...], w2a_ref[...], b2_ref[...]   # (128,32)/(128,16) bf16
    w3, b3 = w3_ref[...], b3_ref[...]            # (32, 128) bf16, (32, 1) f32
    w4, b4 = w4_ref[...], b4_ref[...]            # (32, 1) f32,   (1, 1) f32

    def body(c, carry):
        # Lane-aligned sub-chunk start (constant after full unroll).
        j = pl.multiple_of(c * sub_b, sub_b)
        xs = xs_ref[:, pl.ds(j, sub_b)]          # (S, sub_b) bf16
        xa = xa_ref[:, pl.ds(j, sub_b)]          # (A, sub_b) bf16

        # Layer 1: fcState / fcAction (bf16 MXU, f32 acc); lane-dense bias+ReLU.
        hs = jnp.maximum(
            jnp.dot(ws, xs, preferred_element_type=jnp.float32) + bs, 0.0)
        ha = jnp.maximum(
            jnp.dot(wa, xa, preferred_element_type=jnp.float32) + ba, 0.0)

        # fc2 on the implicit concat: [W2s | W2a] @ [hs ; ha]  (no concat needed).
        h2 = jnp.dot(w2s, hs.astype(jnp.bfloat16),
                     preferred_element_type=jnp.float32)
        h2 = h2 + jnp.dot(w2a, ha.astype(jnp.bfloat16),
                          preferred_element_type=jnp.float32)
        h2 = jnp.maximum(h2 + b2, 0.0)

        # fc3 + ReLU.
        h3 = jnp.maximum(
            jnp.dot(w3, h2.astype(jnp.bfloat16),
                    preferred_element_type=jnp.float32) + b3, 0.0)

        # fc4 head (32 -> 1): VPU multiply + sublane (XLU) reduce -> lane-dense row.
        out_ref[:, pl.ds(j, sub_b)] = (
            jnp.sum(h3 * w4, axis=0, keepdims=True) + b4)
        return carry

    lax.fori_loop(0, n_sub, body, None, unroll=True)


def _choose_tiles(batch, tile_b):
    """Pick (tile_b, sub_b): lane-dense batch tiles, >=2 grid blocks when possible."""
    if batch <= 256:
        # Tiny batches: one full block, or a 2-step grid when it stays lane-dense.
        tile_b = 128 if (batch >= 256 and batch % 128 == 0) else batch
    else:
        # >=2 blocks so both v7x TensorCores get work; multiple of 128 for
        # unmasked lane-dense loads/stores (ragged final block is fine).
        tile_b = min(tile_b, batch, (batch + 1) // 2)
        tile_b = max(128, (tile_b // 128) * 128)
    # In-kernel sub-chunk so f32 activations (128 x sub_b) stay near the vreg budget.
    if tile_b % 128 == 0:
        sub_b = next(c for c in (512, 256, 128) if tile_b % c == 0)
    else:
        sub_b = tile_b
    return tile_b, sub_b


def critic_forward(state, action, params, tile_b=2048):
    """Fused Critic forward.  state: (B, S) f32, action: (B, A) f32 -> (B, 1) f32."""
    B, S = state.shape
    A = action.shape[1]

    # One tiny XLA pass fuses transpose + bf16 cast: the kernel then reads
    # lane-dense bf16 inputs (half the HBM bytes of the old f32 concat round-trip).
    xs = state.T.astype(jnp.bfloat16)     # (S, B)
    xa = action.T.astype(jnp.bfloat16)    # (A, B)

    tile_b, sub_b = _choose_tiles(B, tile_b)
    n_sub = tile_b // sub_b
    grid = (pl.cdiv(B, tile_b),)

    weight_args = (params["ws_t"], params["bs_c"],
                   params["wa_t"], params["ba_c"],
                   params["w2s_t"], params["w2a_t"], params["b2_c"],
                   params["w3_t"], params["b3_c"],
                   params["w4_c"], params["b4_c"])

    def col_spec(rows):
        # batch-tiled operand: grid step i covers lanes [i*tile_b, (i+1)*tile_b)
        return pl.BlockSpec((rows, tile_b), lambda i: (0, i))

    def const_spec(a):
        # weights/biases: same block every step -> stays resident in VMEM
        return pl.BlockSpec(a.shape, lambda i: (0, 0))

    out = pl.pallas_call(
        functools.partial(critic_kernel, sub_b=sub_b, n_sub=n_sub),
        out_shape=jax.ShapeDtypeStruct((1, B), jnp.float32),
        grid=grid,
        in_specs=[col_spec(S), col_spec(A)] + [const_spec(a) for a in weight_args],
        out_specs=pl.BlockSpec((1, tile_b), lambda i: (0, i)),
        compiler_params=pltpu.CompilerParams(
            dimension_semantics=("parallel",)),
    )(xs, xa, *weight_args)

    # (1, B) -> (B, 1): same memory order, layout-free reshape.
    return out.reshape(B, 1)


def init_params(key, state_size, action_size, layer_sizes=(32, 16, 128, 32)):
    """PyTorch-Linear-style init, packed for the transposed (batch-on-lanes) kernel.

    MXU-facing weights are stored pre-transposed (out_features, in_features) in
    bf16; biases are (out_features, 1) f32 columns that broadcast over lanes.
    fc2 is split into its state / action halves so the kernel never concatenates.
    """
    l0, l1, l2, l3 = layer_sizes

    def linear(k, fan_in, fan_out):
        kw, kb = jax.random.split(k)
        bound = 1.0 / jnp.sqrt(jnp.asarray(fan_in, jnp.float32))
        w = jax.random.uniform(kw, (fan_in, fan_out), jnp.float32, -bound, bound)
        b = jax.random.uniform(kb, (fan_out,), jnp.float32, -bound, bound)
        return w, b

    k1, k2, k3, k4, k5 = jax.random.split(key, 5)
    ws, bs = linear(k1, state_size, l0)    # fcState
    wa, ba = linear(k2, action_size, l1)   # fcAction
    w2, b2 = linear(k3, l0 + l1, l2)       # fc2 (acts on the concat)
    w3, b3 = linear(k4, l2, l3)            # fc3
    w4, b4 = linear(k5, l3, 1)             # fc4 head

    return {
        "ws_t": ws.T.astype(jnp.bfloat16),        # (l0, state_size)
        "bs_c": bs.reshape(l0, 1),
        "wa_t": wa.T.astype(jnp.bfloat16),        # (l1, action_size)
        "ba_c": ba.reshape(l1, 1),
        "w2s_t": w2[:l0].T.astype(jnp.bfloat16),  # (l2, l0)
        "w2a_t": w2[l0:].T.astype(jnp.bfloat16),  # (l2, l1)
        "b2_c": b2.reshape(l2, 1),
        "w3_t": w3.T.astype(jnp.bfloat16),        # (l3, l2)
        "b3_c": b3.reshape(l3, 1),
        "w4_c": w4.reshape(l3, 1),                # f32, used on the VPU head
        "b4_c": b4.reshape(1, 1),
    }


def critic_reference(state, action, params):
    """Pure-JAX reference mirroring the kernel's bf16-operand / f32-accumulate math."""
    f32 = jnp.float32
    xs = state.T.astype(jnp.bfloat16)
    xa = action.T.astype(jnp.bfloat16)
    hs = jax.nn.relu(jnp.dot(params["ws_t"], xs, preferred_element_type=f32)
                     + params["bs_c"])
    ha = jax.nn.relu(jnp.dot(params["wa_t"], xa, preferred_element_type=f32)
                     + params["ba_c"])
    h2 = jax.nn.relu(
        jnp.dot(params["w2s_t"], hs.astype(jnp.bfloat16), preferred_element_type=f32)
        + jnp.dot(params["w2a_t"], ha.astype(jnp.bfloat16), preferred_element_type=f32)
        + params["b2_c"])
    h3 = jax.nn.relu(
        jnp.dot(params["w3_t"], h2.astype(jnp.bfloat16), preferred_element_type=f32)
        + params["b3_c"])
    q = jnp.sum(h3 * params["w4_c"], axis=0, keepdims=True) + params["b4_c"]
    return q.reshape(-1, 1)


if __name__ == "__main__":
    key = jax.random.PRNGKey(0)
    k_state, k_action, k_params = jax.random.split(key, 3)

    batch = 256            # small, but large enough for a 2-step (tile_b=128) grid
    state_size = 8
    action_size = 4

    state = jax.random.normal(k_state, (batch, state_size), jnp.float32)
    action = jax.random.normal(k_action, (batch, action_size), jnp.float32)
    params = init_params(k_params, state_size, action_size)

    q = jax.block_until_ready(critic_forward(state, action, params))
    q_ref = critic_reference(state, action, params)

    assert q.shape == (batch, 1)
    assert jnp.allclose(q, q_ref, atol=2e-3, rtol=2e-3), (
        float(jnp.max(jnp.abs(q - q_ref))))
    print("KERNEL_OK")
</pallas_src>

<mosaic_0001>
module attributes {stable_mosaic.version = 11 : i64} {
  func.func @critic_kernel(%arg0: i32, %arg1: memref<8x128xbf16, #tpu.memory_space<vmem>>, %arg2: memref<4x128xbf16, #tpu.memory_space<vmem>>, %arg3: memref<32x8xbf16, #tpu.memory_space<vmem>>, %arg4: memref<32x1xf32, #tpu.memory_space<vmem>>, %arg5: memref<16x4xbf16, #tpu.memory_space<vmem>>, %arg6: memref<16x1xf32, #tpu.memory_space<vmem>>, %arg7: memref<128x32xbf16, #tpu.memory_space<vmem>>, %arg8: memref<128x16xbf16, #tpu.memory_space<vmem>>, %arg9: memref<128x1xf32, #tpu.memory_space<vmem>>, %arg10: memref<32x128xbf16, #tpu.memory_space<vmem>>, %arg11: memref<32x1xf32, #tpu.memory_space<vmem>>, %arg12: memref<32x1xf32, #tpu.memory_space<vmem>>, %arg13: memref<1x1xf32, #tpu.memory_space<vmem>>, %arg14: memref<1x128xf32, #tpu.memory_space<vmem>>) attributes {dimension_semantics = [#tpu.dimension_semantics<parallel>], iteration_bounds = array<i64: 2>, scalar_prefetch = 0 : i64, scratch_operands = 0 : i64, tpu.core_type = #tpu.core_type<tc>, window_params = [{transform_indices = @transform_0, window_bounds = array<i64: 8, 128>}, {transform_indices = @transform_1, window_bounds = array<i64: 4, 128>}, {pipeline_mode = #tpu.pipeline_mode<synchronous>, transform_indices = @transform_2, window_bounds = array<i64: 32, 8>}, {pipeline_mode = #tpu.pipeline_mode<synchronous>, transform_indices = @transform_3, window_bounds = array<i64: 32, 1>}, {pipeline_mode = #tpu.pipeline_mode<synchronous>, transform_indices = @transform_4, window_bounds = array<i64: 16, 4>}, {pipeline_mode = #tpu.pipeline_mode<synchronous>, transform_indices = @transform_5, window_bounds = array<i64: 16, 1>}, {pipeline_mode = #tpu.pipeline_mode<synchronous>, transform_indices = @transform_6, window_bounds = array<i64: 128, 32>}, {pipeline_mode = #tpu.pipeline_mode<synchronous>, transform_indices = @transform_7, window_bounds = array<i64: 128, 16>}, {pipeline_mode = #tpu.pipeline_mode<synchronous>, transform_indices = @transform_8, window_bounds = array<i64: 128, 1>}, {pipeline_mode = #tpu.pipeline_mode<synchronous>, transform_indices = @transform_9, window_bounds = array<i64: 32, 128>}, {pipeline_mode = #tpu.pipeline_mode<synchronous>, transform_indices = @transform_10, window_bounds = array<i64: 32, 1>}, {pipeline_mode = #tpu.pipeline_mode<synchronous>, transform_indices = @transform_11, window_bounds = array<i64: 32, 1>}, {pipeline_mode = #tpu.pipeline_mode<synchronous>, transform_indices = @transform_12, window_bounds = array<i64: 1, 1>}, {transform_indices = @transform_13, window_bounds = array<i64: 1, 128>}]} {
    %c0 = arith.constant 0 : index
    %c0_0 = arith.constant 0 : index
    %0 = vector.load %arg3[%c0, %c0_0] : memref<32x8xbf16, #tpu.memory_space<vmem>>, vector<32x8xbf16>
    %c0_1 = arith.constant 0 : index
    %c0_2 = arith.constant 0 : index
    %1 = vector.load %arg4[%c0_1, %c0_2] : memref<32x1xf32, #tpu.memory_space<vmem>>, vector<32x1xf32>
    %c0_3 = arith.constant 0 : index
    %c0_4 = arith.constant 0 : index
    %2 = vector.load %arg5[%c0_3, %c0_4] : memref<16x4xbf16, #tpu.memory_space<vmem>>, vector<16x4xbf16>
    %c0_5 = arith.constant 0 : index
    %c0_6 = arith.constant 0 : index
    %3 = vector.load %arg6[%c0_5, %c0_6] : memref<16x1xf32, #tpu.memory_space<vmem>>, vector<16x1xf32>
    %c0_7 = arith.constant 0 : index
    %c0_8 = arith.constant 0 : index
    %4 = vector.load %arg7[%c0_7, %c0_8] : memref<128x32xbf16, #tpu.memory_space<vmem>>, vector<128x32xbf16>
    %c0_9 = arith.constant 0 : index
    %c0_10 = arith.constant 0 : index
    %5 = vector.load %arg8[%c0_9, %c0_10] : memref<128x16xbf16, #tpu.memory_space<vmem>>, vector<128x16xbf16>
    %c0_11 = arith.constant 0 : index
    %c0_12 = arith.constant 0 : index
    %6 = vector.load %arg9[%c0_11, %c0_12] : memref<128x1xf32, #tpu.memory_space<vmem>>, vector<128x1xf32>
    %c0_13 = arith.constant 0 : index
    %c0_14 = arith.constant 0 : index
    %7 = vector.load %arg10[%c0_13, %c0_14] : memref<32x128xbf16, #tpu.memory_space<vmem>>, vector<32x128xbf16>
    %c0_15 = arith.constant 0 : index
    %c0_16 = arith.constant 0 : index
    %8 = vector.load %arg11[%c0_15, %c0_16] : memref<32x1xf32, #tpu.memory_space<vmem>>, vector<32x1xf32>
    %c0_17 = arith.constant 0 : index
    %c0_18 = arith.constant 0 : index
    %9 = vector.load %arg12[%c0_17, %c0_18] : memref<32x1xf32, #tpu.memory_space<vmem>>, vector<32x1xf32>
    %c0_19 = arith.constant 0 : index
    %c0_20 = arith.constant 0 : index
    %10 = vector.load %arg13[%c0_19, %c0_20] : memref<1x1xf32, #tpu.memory_space<vmem>>, vector<1x1xf32>
    %c0_i32 = arith.constant 0 : i32
    %c128_i32 = arith.constant 128 : i32
    %11 = arith.muli %c0_i32, %c128_i32 : i32
    %12 = tpu.assume_multiple %11, 128 : i32
    %c0_21 = arith.constant 0 : index
    %13 = arith.index_cast %12 : i32 to index
    %14 = vector.load %arg1[%c0_21, %13] : memref<8x128xbf16, #tpu.memory_space<vmem>>, vector<8x128xbf16>
    %c0_22 = arith.constant 0 : index
    %15 = arith.index_cast %12 : i32 to index
    %16 = vector.load %arg2[%c0_22, %15] : memref<4x128xbf16, #tpu.memory_space<vmem>>, vector<4x128xbf16>
    %cst = arith.constant dense<0.000000e+00> : vector<32x128xf32>
    %17 = tpu.matmul %0, %14, %cst {dimension_numbers = #tpu.dot_dimension_numbers<[1], [0], [0], [1], [0, 0, 1, 1], [], []>} : vector<32x8xbf16>, vector<8x128xbf16>, vector<32x128xf32> -> vector<32x128xf32>
    %18 = vector.broadcast %1 : vector<32x1xf32> to vector<32x128xf32>
    %19 = arith.addf %17, %18 : vector<32x128xf32>
    %cst_23 = arith.constant 0.000000e+00 : f32
    %20 = vector.broadcast %cst_23 : f32 to vector<32x128xf32>
    %21 = arith.maximumf %19, %20 : vector<32x128xf32>
    %cst_24 = arith.constant dense<0.000000e+00> : vector<16x128xf32>
    %22 = tpu.matmul %2, %16, %cst_24 {dimension_numbers = #tpu.dot_dimension_numbers<[1], [0], [0], [1], [0, 0, 1, 1], [], []>} : vector<16x4xbf16>, vector<4x128xbf16>, vector<16x128xf32> -> vector<16x128xf32>
    %23 = vector.broadcast %3 : vector<16x1xf32> to vector<16x128xf32>
    %24 = arith.addf %22, %23 : vector<16x128xf32>
    %cst_25 = arith.constant 0.000000e+00 : f32
    %25 = vector.broadcast %cst_25 : f32 to vector<16x128xf32>
    %26 = arith.maximumf %24, %25 : vector<16x128xf32>
    %27 = arith.truncf %21 : vector<32x128xf32> to vector<32x128xbf16>
    %cst_26 = arith.constant dense<0.000000e+00> : vector<128x128xf32>
    %28 = tpu.matmul %4, %27, %cst_26 {dimension_numbers = #tpu.dot_dimension_numbers<[1], [0], [0], [1], [0, 0, 1, 1], [], []>} : vector<128x32xbf16>, vector<32x128xbf16>, vector<128x128xf32> -> vector<128x128xf32>
    %29 = arith.truncf %26 : vector<16x128xf32> to vector<16x128xbf16>
    %cst_27 = arith.constant dense<0.000000e+00> : vector<128x128xf32>
    %30 = tpu.matmul %5, %29, %cst_27 {dimension_numbers = #tpu.dot_dimension_numbers<[1], [0], [0], [1], [0, 0, 1, 1], [], []>} : vector<128x16xbf16>, vector<16x128xbf16>, vector<128x128xf32> -> vector<128x128xf32>
    %31 = arith.addf %28, %30 : vector<128x128xf32>
    %32 = vector.broadcast %6 : vector<128x1xf32> to vector<128x128xf32>
    %33 = arith.addf %31, %32 : vector<128x128xf32>
    %cst_28 = arith.constant 0.000000e+00 : f32
    %34 = vector.broadcast %cst_28 : f32 to vector<128x128xf32>
    %35 = arith.maximumf %33, %34 : vector<128x128xf32>
    %36 = arith.truncf %35 : vector<128x128xf32> to vector<128x128xbf16>
    %cst_29 = arith.constant dense<0.000000e+00> : vector<32x128xf32>
    %37 = tpu.matmul %7, %36, %cst_29 {dimension_numbers = #tpu.dot_dimension_numbers<[1], [0], [0], [1], [0, 0, 1, 1], [], []>} : vector<32x128xbf16>, vector<128x128xbf16>, vector<32x128xf32> -> vector<32x128xf32>
    %38 = vector.broadcast %8 : vector<32x1xf32> to vector<32x128xf32>
    %39 = arith.addf %37, %38 : vector<32x128xf32>
    %cst_30 = arith.constant 0.000000e+00 : f32
    %40 = vector.broadcast %cst_30 : f32 to vector<32x128xf32>
    %41 = arith.maximumf %39, %40 : vector<32x128xf32>
    %42 = vector.broadcast %9 : vector<32x1xf32> to vector<32x128xf32>
    %43 = arith.mulf %41, %42 : vector<32x128xf32>
    %cst_31 = arith.constant dense<0.000000e+00> : vector<128xf32>
    %44 = vector.multi_reduction <add>, %43, %cst_31 [0] : vector<32x128xf32> to vector<128xf32>
    %45 = vector.shape_cast %44 : vector<128xf32> to vector<1x128xf32>
    %46 = vector.broadcast %10 : vector<1x1xf32> to vector<1x128xf32>
    %47 = arith.addf %45, %46 : vector<1x128xf32>
    %c0_32 = arith.constant 0 : index
    %48 = arith.index_cast %12 : i32 to index
    %49 = vector.load %arg14[%c0_32, %48] : memref<1x128xf32, #tpu.memory_space<vmem>>, vector<1x128xf32>
    tpu.vector_store %arg14[%c0_32, %48], %47 {strides = array<i32>} : memref<1x128xf32, #tpu.memory_space<vmem>>, vector<1x128xf32>,
    %c1_i32 = arith.constant 1 : i32
    return
  }
  func.func @transform_0(%arg0: i32) -> (i32, i32) {
    %c0_i32 = arith.constant 0 : i32
    %c0_i32_0 = arith.constant 0 : i32
    return %c0_i32, %arg0 : i32, i32
  }
  func.func @transform_1(%arg0: i32) -> (i32, i32) {
    %c0_i32 = arith.constant 0 : i32
    %c0_i32_0 = arith.constant 0 : i32
    return %c0_i32, %arg0 : i32, i32
  }
  func.func @transform_2(%arg0: i32) -> (i32, i32) {
    %c0_i32 = arith.constant 0 : i32
    %c0_i32_0 = arith.constant 0 : i32
    %c0_i32_1 = arith.constant 0 : i32
    return %c0_i32, %c0_i32_0 : i32, i32
  }
  func.func @transform_3(%arg0: i32) -> (i32, i32) {
    %c0_i32 = arith.constant 0 : i32
    %c0_i32_0 = arith.constant 0 : i32
    %c0_i32_1 = arith.constant 0 : i32
    return %c0_i32, %c0_i32_0 : i32, i32
  }
  func.func @transform_4(%arg0: i32) -> (i32, i32) {
    %c0_i32 = arith.constant 0 : i32
    %c0_i32_0 = arith.constant 0 : i32
    %c0_i32_1 = arith.constant 0 : i32
    return %c0_i32, %c0_i32_0 : i32, i32
  }
  func.func @transform_5(%arg0: i32) -> (i32, i32) {
    %c0_i32 = arith.constant 0 : i32
    %c0_i32_0 = arith.constant 0 : i32
    %c0_i32_1 = arith.constant 0 : i32
    return %c0_i32, %c0_i32_0 : i32, i32
  }
  func.func @transform_6(%arg0: i32) -> (i32, i32) {
    %c0_i32 = arith.constant 0 : i32
    %c0_i32_0 = arith.constant 0 : i32
    %c0_i32_1 = arith.constant 0 : i32
    return %c0_i32, %c0_i32_0 : i32, i32
  }
  func.func @transform_7(%arg0: i32) -> (i32, i32) {
    %c0_i32 = arith.constant 0 : i32
    %c0_i32_0 = arith.constant 0 : i32
    %c0_i32_1 = arith.constant 0 : i32
    return %c0_i32, %c0_i32_0 : i32, i32
  }
  func.func @transform_8(%arg0: i32) -> (i32, i32) {
    %c0_i32 = arith.constant 0 : i32
    %c0_i32_0 = arith.constant 0 : i32
    %c0_i32_1 = arith.constant 0 : i32
    return %c0_i32, %c0_i32_0 : i32, i32
  }
  func.func @transform_9(%arg0: i32) -> (i32, i32) {
    %c0_i32 = arith.constant 0 : i32
    %c0_i32_0 = arith.constant 0 : i32
    %c0_i32_1 = arith.constant 0 : i32
    return %c0_i32, %c0_i32_0 : i32, i32
  }
  func.func @transform_10(%arg0: i32) -> (i32, i32) {
    %c0_i32 = arith.constant 0 : i32
    %c0_i32_0 = arith.constant 0 : i32
    %c0_i32_1 = arith.constant 0 : i32
    return %c0_i32, %c0_i32_0 : i32, i32
  }
  func.func @transform_11(%arg0: i32) -> (i32, i32) {
    %c0_i32 = arith.constant 0 : i32
    %c0_i32_0 = arith.constant 0 : i32
    %c0_i32_1 = arith.constant 0 : i32
    return %c0_i32, %c0_i32_0 : i32, i32
  }
  func.func @transform_12(%arg0: i32) -> (i32, i32) {
    %c0_i32 = arith.constant 0 : i32
    %c0_i32_0 = arith.constant 0 : i32
    %c0_i32_1 = arith.constant 0 : i32
    return %c0_i32, %c0_i32_0 : i32, i32
  }
  func.func @transform_13(%arg0: i32) -> (i32, i32) {
    %c0_i32 = arith.constant 0 : i32
    %c0_i32_0 = arith.constant 0 : i32
    return %c0_i32, %arg0 : i32, i32
  }
}

</mosaic_0001>

<bundles_post_ra>
// kernel: tpu_custom_call.1
= control target key start
LH: loop header
LB: loop body
LE: loop exit
PB: predicated region body
PF: predicated region fallthrough
CT: control target
= control target key end

     0   :  { %s1999_s0 = inlined_call_operand.vmem [shape: bf16[8,256], index: 0, kind: input, shape index: {}]   ;;  %s2000_s1 = inlined_call_operand.vmem [shape: bf16[4,256], index: 1, kind: input, shape index: {}]   ;;  %s2001_s2 = inlined_call_operand.vmem [shape: bf16[32,8], index: 2, kind: input, shape index: {}]   ;;  %s2002_s3 = inlined_call_operand.vmem [shape: f32[32,1], index: 3, kind: input, shape index: {}]   ;;  %s2003_s4 = inlined_call_operand.vmem [shape: bf16[16,4], index: 4, kind: input, shape index: {}]   ;;  %s2004_s5 = inlined_call_operand.vmem [shape: f32[16,1], index: 5, kind: input, shape index: {}]   ;;  %s2005_s6 = inlined_call_operand.vmem [shape: bf16[128,32], index: 6, kind: input, shape index: {}]   ;;  %s2006_s7 = inlined_call_operand.vmem [shape: bf16[128,16], index: 7, kind: input, shape index: {}]   ;;  %s2007_s8 = inlined_call_operand.vmem [shape: f32[128,1], index: 8, kind: input, shape index: {}]   ;;  %s2008_s9 = inlined_call_operand.vmem [shape: bf16[32,128], index: 9, kind: input, shape index: {}]   ;;  %s2009_s10 = inlined_call_operand.vmem [shape: f32[32,1], index: 10, kind: input, shape index: {}]   ;;  %s2010_s11 = inlined_call_operand.vmem [shape: f32[32,1], index: 11, kind: input, shape index: {}]   ;;  %s2011_s12 = inlined_call_operand.<no memory space> [shape: f32[1,1], index: 12, kind: input, shape index: {}]   ;;  %s2012_s13 = inlined_call_operand.hbm [shape: f32[1,256], index: 13, kind: output, shape index: {}]  }
   0x1   :  { %v18_v0 = vstv %s2011_s12 }
   0x2   :  { %19 = vst [vmem:[#allocation2] sm:$0x1] %v18_v0 }
   0x3   :  { %20 = vsyncpa [#allocation4], 0 }
   0x4   :  { %22 = vsyncpa [#allocation4 + $0x1], 0  ;;  %s1722_s27 = smov 0   ;;  %s1724_s28 = smov 0  }
   0x5   :  { %s1726_s29 = smov 0   ;;  %s1728_s30 = smov 0  }
   0x6 LB: > { %2018 = sst [smem:[#allocation6_spill]] %s1631_s27  ;;  %s1743_s12 = sadd.s32 4294967295, %s1643_s30   ;;  %s1643_s30 = sphi %s1728_s30, %s2027_s30   ;;  %s1639_s29 = sphi %s1726_s29, %s2029_s29   ;;  %s1635_s28 = sphi %s1724_s28, %s2031_s28   ;;  %s1631_s27 = sphi %s1722_s27, %s2030_s27  }
   0x7   : > { %2019 = sst [smem:[#allocation7_spill]] %s1639_s29  ;;  %s1346_s14 = sadd.s32 4294967294, %s1643_s30  }
   0x8   : > { %s1747_s15 = sadd.s32 1, %s1643_s30   ;;  %s318_s16 = sadd.s32 1, %s1639_s29 }
   0x9   : > { %2020 = sst [smem:[#allocation8_spill]] %s1747_s15  ;;  %s315_s17 = ssub.s32 %s1643_s30, %s1747_s15 }
   0xa   : > { %p328_p0 = scmp.ne.s32.totalorder %s1639_s29, %s1635_s28  ;;  %p316_p1 = scmp.eq.s32.totalorder %s315_s17, 0 }
   0xb   : > { %p329_p2 = scmp.eq.s32.totalorder %s1743_s12, 1  ;;  %p334_p3 = scmp.ne.s32.totalorder %s1635_s28, %s1631_s27 }
   0xc   : > { %p335_p4 = scmp.eq.s32.totalorder %s1346_s14, 1  ;;  %p1349_p7 = scmp.ge.s32.totalorder %s1643_s30, 1 }
   0xd   : > { %s1758_s18 = scalar_select %p316_p1, %s1639_s29, %s318_s16  }
   0xe   : > { %p1760_p5 = por %p329_p2, %p328_p0  ;;  %p1764_p6 = por %p335_p4, %p334_p3 }
   0xf   : > { %2021 = sst [smem:[#allocation9_spill]] %s1758_s18  ;;  %p400_p8 = scmp.lt.s32.totalorder %s1643_s30, 3 }
  0x10   : > { %s2023_s20 = scalar_select %p1764_p6, 1, 0 }
  0x11   : > { %p401_p9 = pnand %p1349_p7, %p400_p8 }
  0x12   : > { %2024 = sst [smem:[#allocation10_spill]] %s2023_s20  ;;  %p446_p10 = scmp.lt.s32.totalorder (!%p401_p9), %s1743_s12, 1  ;;  %v1645_v1 = vmov (!%p401_p9), 0.0   ;;  %v1560_v2 = vld [vmem:[%s2001_s2] sm:$0xff] (!%p401_p9)   ;;  %vm560_vm0 = vcmask (!%p401_p9), 64512   ;;  %vm1646_vm1 = vmmov (!%p401_p9), 0  }
  0x13   : > { %404 = sbr.rel (%p401_p9) target bundleno = 774 (0x306), region = 72  ;;  %1435 = vmatprep.subr.bf16.mxu1 (!%p401_p9), %v1645_v1  ;;  %1437 = vmatprep.mubr.msk.bf16.mxu1 (!%p401_p9), %vm1646_vm1, %v1645_v1  ;;  %vm567_vm2 = vcmask (!%p401_p9), 1043456   ;;  %vm643_vm3 = vcmask (!%p401_p9), 1041408   ;;  %v1647_v3 = vmov (!%p401_p9), 0   ;;  %v459_v4 = vld [vmem:[%s2002_s3] sm:$0xff] (!%p401_p9)  ;;  %v461_v5 = vld [vmem:[%s2002_s3 + $0x10] sm:$0xff] (!%p401_p9) }
  0x14   : > { %1431 = vmatprep.mubr.msk.bf16.mxu0 (!%p401_p9), %vm560_vm0, %v1560_v2  ;;  %1558 = vset.pattern.permute.xlu0 (!%p401_p9), %v1647_v3  ;;  %v460_v6 = vld [vmem:[%s2002_s3 + $0x8] sm:$0xff] (!%p401_p9)  ;;  %v462_v9 = vld [vmem:[%s2002_s3 + $0x18] sm:$0xff] (!%p401_p9)  ;;  %v1562_v13 = vld [vmem:[%s2003_s4] sm:$0xff] (!%p401_p9)   ;;  %vm639_vm4 = vcmask (!%p401_p9), 31744   ;;  %vm733_vm5 = vcmask (!%p401_p9), 130048   ;;  %vm895_vm6 = vcmask (!%p401_p9), 261120  }
  0x15   : > { %1559 = vset.pattern.permute.xlu1 (!%p401_p9), %v1647_v3  ;;  %532 = vperm.xlu0 (!%p401_p9), %1558, %v459_v4   ;;  %v1561_v12 = vld [vmem:[%s2001_s2 + $0x8] sm:$0xff] (!%p401_p9)   ;;  %v465_v14 = vld [vmem:[%s2004_s5] sm:$0xff] (!%p401_p9)  ;;  %v501_v18 = vld [vmem:[%s2007_s8 + $0x10] sm:$0xff] (!%p401_p9)  ;;  %s444_s17 = sand.u32 (!%p401_p9), 1, %s1635_s28   ;;  %s1392_s21 = sshll.u32 (!%p401_p9), %s1743_s12, 4 }
  0x16   : > { %542 = vperm.xlu1 (!%p401_p9), %1559, %v461_v5   ;;  %v466_v15 = vld [vmem:[%s2004_s5 + $0x8] sm:$0xff] (!%p401_p9)  ;;  %v499_v16 = vld [vmem:[%s2007_s8] sm:$0xff] (!%p401_p9)  ;;  %v502_v19 = vld [vmem:[%s2007_s8 + $0x18] sm:$0xff] (!%p401_p9)  ;;  %s445_s22 = scalar_lea.vmem (!%p401_p9), [#allocation3], %s444_s17  ;;  %s1957_s29 = scalar_lea.hbm (!%p401_p9), %s2012_s13, %s1392_s21 }
  0x17   : > { %v500_v17 = vld [vmem:[%s2007_s8 + $0x8] sm:$0xff] (!%p401_p9)  ;;  %v503_v20 = vld [vmem:[%s2007_s8 + $0x20] sm:$0xff] (!%p401_p9)  ;;  %v505_v22 = vld [vmem:[%s2007_s8 + $0x30] sm:$0xff] (!%p401_p9)  ;;  %s1267_s15 = scalar_lea.sflag (!%p401_p9), [#allocation4], %s444_s17 }
  0x18   : > { %v504_v21 = vld [vmem:[%s2007_s8 + $0x28] sm:$0xff] (!%p401_p9)  ;;  %v506_v23 = vld [vmem:[%s2007_s8 + $0x38] sm:$0xff] (!%p401_p9)  ;;  %v507_v24 = vld [vmem:[%s2007_s8 + $0x40] sm:$0xff] (!%p401_p9) }
  0x19   : > { %537 = vperm.xlu0 (!%p401_p9), %1558, %v460_v6   ;;  %v508_v25 = vld [vmem:[%s2007_s8 + $0x48] sm:$0xff] (!%p401_p9)  ;;  %v509_v26 = vld [vmem:[%s2007_s8 + $0x50] sm:$0xff] (!%p401_p9)  ;;  %v510_v27 = vld [vmem:[%s2007_s8 + $0x58] sm:$0xff] (!%p401_p9) }
  0x1a   : > { %s447_s23 = scalar_select %p446_p10, %s1743_s12, 1  ;;  %547 = vperm.xlu1 %1559, %v462_v9   ;;  %v511_v28 = vld [vmem:[%s2007_s8 + $0x60] sm:$0xff]  ;;  %v512_v29 = vld [vmem:[%s2007_s8 + $0x68] sm:$0xff]  ;;  %v513_v30 = vld [vmem:[%s2007_s8 + $0x70] sm:$0xff] }
  0x1b   : > { %v514_v31 = vld [vmem:[%s2007_s8 + $0x78] sm:$0xff]  ;;  %v519_v32 = vld [vmem:[%s2009_s10] sm:$0xff]  ;;  %v520_v33 = vld [vmem:[%s2009_s10 + $0x8] sm:$0xff]  ;;  %s1648_s12 = smov [#allocation3]  }
  0x1c   : > { %s1350_s24 = sshll.u32 %s447_s23, 2  ;;  %s1351_s25 = sshll.u32 %s447_s23, 1  ;;  %v521_v34 = vld [vmem:[%s2009_s10 + $0x10] sm:$0xff]  ;;  %v522_v35 = vld [vmem:[%s2009_s10 + $0x18] sm:$0xff]  ;;  %v523_v36 = vld [vmem:[%s2010_s11] sm:$0xff] }
  0x1d   : > { %s449_s18 = scalar_lea.vmem %s1999_s0, %s1350_s24  ;;  %s453_s23 = scalar_lea.vmem %s2000_s1, %s1351_s25  ;;  %626 = vperm.xlu0 %1558, %v465_v14   ;;  %v524_v37 = vld [vmem:[%s2010_s11 + $0x8] sm:$0xff]  ;;  %v525_v38 = vld [vmem:[%s2010_s11 + $0x10] sm:$0xff]  ;;  %v526_v39 = vld [vmem:[%s2010_s11 + $0x18] sm:$0xff] }
  0x1e   : > { %v528_v7 = vld [vmem:[%s449_s18] sm:$0xf]  ;;  %631 = vperm.xlu1 %1559, %v466_v15   ;;  %v1567_v9 = vld [vmem:[%s2006_s7 + $0x10] sm:$0xff]   ;;  %v1570_v14 = vld [vmem:[%s2005_s6 + $0x18] sm:$0xff]   ;;  %s1585_s25 = sshll.u32 %s1648_s12, 4  ;;  %s1586_s25 = int_to_ptr.vmem [resolvable:$false] %s1585_s25 }
  0x1f   : > { %v529_v8 = vld [vmem:[%s453_s23] sm:$0x3]  ;;  %1515 = vmatprep.subr.msk.bf16.mxu0 %vm567_vm2, %v528_v7  ;;  %v569_v10 = vsel %vm567_vm2, %v528_v7, 0  ;;  %s1279_s23 = sshll.u32 %s445_s22, 4  ;;  %s1587_s27 = scalar_lea.vmem %s1586_s25, 32  ;;  %s1959_s23 = int_to_ptr.vmem [resolvable:$true] %s1279_s23 }
  0x20   : > { %v645_v11 = vsel %vm643_vm3, %v529_v8, 0  ;;  %1430 = vmatpush3.bf16.msra.mxu0 %v569_v10  ;;  %v527_v40 = vld [vmem:[#allocation2] sm:$0x1]  ;;  %v1564_v8 = vld [vmem:[%s2006_s7 + $0x8] sm:$0xff]   ;;  %s1581_s24 = scalar_lea.vmem %s1959_s23, 16  ;;  %p1588_p0 = scmp.lt.s32.totalorder %s1959_s23, %s1586_s25 }
  0x21   : > { %1436 = vmatpush3.bf16.msra.mxu1 %v645_v11  ;;  %1019 = vperm.xlu0 %1558, %v499_v16   ;;  %v1563_v41 = vld [vmem:[%s2006_s7] sm:$0xff]   ;;  %v1566_v10 = vld [vmem:[%s2005_s6 + $0x8] sm:$0xff]   ;;  %v1569_v11 = vld [vmem:[%s2005_s6 + $0x10] sm:$0xff]   ;;  %p1582_p11 = scmp.ne.s32.totalorder %s1959_s23, %s1581_s24  ;;  %p1589_p1 = scmp.lt.s32.totalorder %s1587_s27, %s1581_s24 }
  0x22   : > { %1024 = vperm.xlu1 %1559, %v500_v17   ;;  %v1565_v42 = vld [vmem:[%s2005_s6] sm:$0xff]   ;;  %v1572_v16 = vld [vmem:[%s2006_s7 + $0x28] sm:$0xff]   ;;  %v1575_v17 = vld [vmem:[%s2006_s7 + $0x30] sm:$0xff]  }
  0x23   : > { %1432 = vmatmul.mubr.msk.bf16.vlgmr.msra.gmra.mrb[0].mxu0 %vm560_vm0, %v1561_v12  ;;  %v1568_v12 = vld [vmem:[%s2006_s7 + $0x18] sm:$0xff]   ;;  %v1573_v15 = vld [vmem:[%s2005_s6 + $0x20] sm:$0xff]   ;;  %p1583_p12 = pnand %p1582_p11, %p1760_p5  ;;  %p1590_p2 = por %p1589_p1, %p1588_p0 }
  0x24   : > { %1438 = vmatmul.mubr.msk.bf16.vlgmr.msra.gmra.mrb[0].mxu1 %vm639_vm4, %v1562_v13  ;;  %1463 = vmatprep.mubr.msk.bf16.mxu0 %vm895_vm6, %v1565_v42  ;;  %v1571_v13 = vld [vmem:[%s2006_s7 + $0x20] sm:$0xff]  }
  0x25   : > { %1029 = vperm.xlu0 %1558, %v501_v18   ;;  %1443 = vmatprep.mubr.msk.bf16.mxu1 %vm733_vm5, %v1563_v41  ;;  %v1574_v18 = vld [vmem:[%s2005_s6 + $0x28] sm:$0xff]   ;;  %p1584_p13 = pneg %p1583_p12 }
  0x26   : > { %1034 = vperm.xlu1 %1559, %v502_v19   ;;  %v1577_v19 = vld [vmem:[%s2005_s6 + $0x30] sm:$0xff]  }
  0x27   : > { %p1591_p3 = pnand %p1590_p2, %p1584_p13 }
  0x29   : > { %1039 = vperm.xlu0 %1558, %v503_v20   ;;  %v1576_v20 = vld [vmem:[%s2006_s7 + $0x38] sm:$0xff]  }
  0x2a   : > { %1044 = vperm.xlu1 %1559, %v504_v21   ;;  %v1578_v21 = vld [vmem:[%s2005_s6 + $0x38] sm:$0xff]  }
  0x2d   : > { %1049 = vperm.xlu0 %1558, %v505_v22   ;;  %v1579_v22 = vld [vmem:[%s2008_s9] sm:$0xff]  }
  0x2e   : > { %1054 = vperm.xlu1 %1559, %v506_v23  }
  0x31   : > { %1059 = vperm.xlu0 %1558, %v507_v24  }
  0x32   : > { %1064 = vperm.xlu1 %1559, %v508_v25  }
  0x35   : > { %1069 = vperm.xlu0 %1558, %v509_v26  }
  0x36   : > { %1074 = vperm.xlu1 %1559, %v510_v27  }
  0x39   : > { %1079 = vperm.xlu0 %1558, %v511_v28  }
  0x3a   : > { %1084 = vperm.xlu1 %1559, %v512_v29  }
  0x3d   : > { %1089 = vperm.xlu0 %1558, %v513_v30  }
  0x3e   : > { %1094 = vperm.xlu1 %1559, %v514_v31  }
  0x41   : > { %1139 = vperm.xlu0 %1558, %v519_v32  }
  0x42   : > { %1144 = vperm.xlu1 %1559, %v520_v33  }
  0x45   : > { %1149 = vperm.xlu0 %1558, %v521_v34  }
  0x46   : > { %1154 = vperm.xlu1 %1559, %v522_v35  }
  0x49   : > { %1224 = vperm.xlu0 %1558, %v523_v36  }
  0x4a   : > { %1229 = vperm.xlu1 %1559, %v524_v37  }
  0x4d   : > { %1234 = vperm.xlu0 %1558, %v525_v38  }
  0x4e   : > { %1239 = vperm.xlu1 %1559, %v526_v39  }
  0x51   : > { %1257 = vperm.xlu0 %1558, %v527_v40  }
  0x94   : > { %v533_v43 = vpop.permute.xlu0 %532 }
  0x95   : > { %v543_v44 = vpop.permute.xlu1 %542 }
  0x98   : > { %v538_v45 = vpop.permute.xlu0 %537 }
  0x99   : > { %v548_v46 = vpop.permute.xlu1 %547 }
  0x9c   : > { %v627_v47 = vpop.permute.xlu0 %626 }
  0x9d   : > { %v632_v48 = vpop.permute.xlu1 %631 }
  0xa0   : > { %v1020_v23 = vpop.permute.xlu0 %1019 }
  0xa1   : > { %v1025_v24 = vpop.permute.xlu1 %1024 }
  0xa4   : > { %v1030_v25 = vpop.permute.xlu0 %1029 }
  0xa5   : > { %v1035_v26 = vpop.permute.xlu1 %1034 }
  0xa8   : > { %v1040_v28 = vpop.permute.xlu0 %1039 }
  0xa9   : > { %v1045_v31 = vpop.permute.xlu1 %1044 }
  0xac   : > { %v1050_v36 = vpop.permute.xlu0 %1049 }
  0xf6   : > { %v1433_v49 = vpop.f32.mrb[0].mxu0 }
  0xf7   : > { %v681_v50 = vpop.f32.mrb[0].mxu1  ;;  %v614_v51 = vadd.f32 %v1433_v49, %v543_v44  ;;  %v605_v53 = vpop.f32.mrb[1].mxu0 }
  0xf8   : > { %v682_v52 = vadd.f32 %v681_v50, %v627_v47  ;;  %v1439_v54 = vpop.f32.mrb[1].mxu1  ;;  %v606_v55 = vadd.f32 %v605_v53, %v533_v43  ;;  %v1434_v56 = vpop.f32.mrb[2].mxu0 }
  0xf9   : > { %v684_v57 = vpop.f32.mrb[2].mxu1  ;;  %v617_v58 = vadd.f32 %v1434_v56, %v548_v46  ;;  %v608_v60 = vpop.f32.mrb[3].mxu0  ;;  %v622_v63 = vmax.f32 %v614_v51, 0.0 }
  0xfa   : > { %v685_v59 = vadd.f32 %v684_v57, %v632_v48  ;;  %v1440_v61 = vpop.f32.mrb[3].mxu1  ;;  %v609_v62 = vadd.f32 %v608_v60, %v538_v45  ;;  %v688_v0 = vmax.f32 %v682_v52, 0.0  ;;  %v620_v3 = vmax.f32 %v606_v55, 0.0  ;;  %v1055_v43 = vpop.permute.xlu1 %1054 }
  0xfb   : > { %v623_v1 = vmax.f32 %v617_v58, 0.0  ;;  %v1060_v53 = vpop.permute.xlu0 %1059 }
  0xfc   : > { %v689_v2 = vmax.f32 %v685_v59, 0.0  ;;  %v621_v4 = vmax.f32 %v609_v62, 0.0 }
  0xfd   : > { %v691_v5 = vpack.c.bf16 %v623_v1, %v622_v63 }
  0xfe   : > { %v692_v6 = vpack.c.bf16 %v689_v2, %v688_v0  ;;  %v690_v7 = vpack.c.bf16 %v621_v4, %v620_v3  ;;  %v1065_v60 = vpop.permute.xlu1 %1064 }
 0x100   : > { %1441 = vmatprep.subr.bf16.mxu1 %v692_v6  ;;  %1459 = vmatprep.subr.bf16.mxu0 %v690_v7 }
 0x101   : > { %1442 = vmatpush3.bf16.msra.mxu1 %v692_v6  ;;  %1460 = vmatpush3.bf16.msra.mxu0 %v690_v7 }
 0x102   : > { %1461 = vmatprep.subr.bf16.mxu0 %v691_v5 }
 0x104   : > { %1444 = vmatmul.mubr.msk.bf16.vlgmr.msra.gmra.mrb[4].mxu1 %vm733_vm5, %v1564_v8 }
 0x105   : > { %1447 = vmatprep.mubr.msk.bf16.mxu1 %vm733_vm5, %v1567_v9  ;;  %1462 = vmatpush3.bf16.msra.mxu0 %v691_v5  ;;  %v1070_v9 = vpop.permute.xlu0 %1069 }
 0x108   : > { %1464 = vmatmul.mubr.msk.bf16.vlgmr.msra.gmra.mrb[4].mxu0 %vm895_vm6, %v1566_v10 }
 0x109   : > { %1467 = vmatprep.mubr.msk.bf16.mxu0 %vm895_vm6, %v1569_v11 }
 0x10c   : > { %1448 = vmatmul.mubr.msk.bf16.gmra.mrb[8].mxu1 %vm733_vm5, %v1568_v12 }
 0x10d   : > { %1451 = vmatprep.mubr.msk.bf16.mxu1 %vm733_vm5, %v1571_v13 }
 0x110   : > { %1468 = vmatmul.mubr.msk.bf16.gmra.mrb[8].mxu0 %vm895_vm6, %v1570_v14  ;;  %v1075_v14 = vpop.permute.xlu1 %1074 }
 0x111   : > { %1471 = vmatprep.mubr.msk.bf16.mxu0 %vm895_vm6, %v1573_v15 }
 0x114   : > { %1452 = vmatmul.mubr.msk.bf16.gmra.mrb[12].mxu1 %vm733_vm5, %v1572_v16 }
 0x115   : > { %1455 = vmatprep.mubr.msk.bf16.mxu1 %vm733_vm5, %v1575_v17 }
 0x118   : > { %1472 = vmatmul.mubr.msk.bf16.gmra.mrb[12].mxu0 %vm895_vm6, %v1574_v18 }
 0x119   : > { %1475 = vmatprep.mubr.msk.bf16.mxu0 %vm895_vm6, %v1577_v19 }
 0x11c   : > { %1456 = vmatmul.mubr.msk.bf16.gmra.mrb[16].mxu1 %vm733_vm5, %v1576_v20 }
 0x11d   : > { %1495 = vmatprep.mubr.bf16.mxu1 %v1579_v22 }
 0x120   : > { %1476 = vmatmul.mubr.msk.bf16.gmra.mrb[16].mxu0 %vm895_vm6, %v1578_v21 }
 0x1d7   : > { %v1445_v27 = vpop.f32.mrb[4].mxu1 }
 0x1d8   : > { %v792_v29 = vpop.f32.mrb[5].mxu1 }
 0x1d9   : > { %v1446_v30 = vpop.f32.mrb[6].mxu1 }
 0x1da   : > { %v795_v32 = vpop.f32.mrb[7].mxu1 }
 0x1db   : > { %v1465_v33 = vpop.f32.mrb[4].mxu0 }
 0x1dc   : > { %v963_v34 = vadd.f32 %v1465_v33, %v1445_v27  ;;  %v954_v35 = vpop.f32.mrb[5].mxu0 }
 0x1dd   : > { %v955_v37 = vadd.f32 %v954_v35, %v792_v29  ;;  %v1466_v38 = vpop.f32.mrb[6].mxu0 }
 0x1de   : > { %v1099_v39 = vadd.f32 %v1030_v25, %v963_v34  ;;  %v966_v40 = vadd.f32 %v1466_v38, %v1446_v30  ;;  %v957_v41 = vpop.f32.mrb[7].mxu0  ;;  %v1085_v34 = vpop.permute.xlu1 %1084 }
 0x1df   : > { %v1449_v42 = vpop.f32.mrb[8].mxu1  ;;  %v1097_v44 = vadd.f32 %v1020_v23, %v955_v37  ;;  %v958_v45 = vadd.f32 %v957_v41, %v795_v32 }
 0x1e0   : > { %v808_v46 = vpop.f32.mrb[9].mxu1  ;;  %v1100_v47 = vadd.f32 %v1035_v26, %v966_v40  ;;  %v1115_v51 = vmax.f32 %v1099_v39, 0.0 }
 0x1e1   : > { %v1450_v48 = vpop.f32.mrb[10].mxu1  ;;  %v1098_v49 = vadd.f32 %v1025_v24, %v958_v45  ;;  %v1113_v54 = vmax.f32 %v1097_v44, 0.0 }
 0x1e2   : > { %v811_v50 = vpop.f32.mrb[11].mxu1  ;;  %v1116_v52 = vmax.f32 %v1100_v47, 0.0 }
 0x1e3   : > { %v1114_v55 = vmax.f32 %v1098_v49, 0.0  ;;  %v1469_v56 = vpop.f32.mrb[8].mxu0 }
 0x1e4   : > { %v979_v57 = vadd.f32 %v1469_v56, %v1449_v42  ;;  %v970_v58 = vpop.f32.mrb[9].mxu0  ;;  %v1130_v59 = vpack.c.bf16 %v1116_v52, %v1115_v51  ;;  %v1095_v52 = vpop.permute.xlu1 %1094 }
 0x1e5   : > { %v971_v61 = vadd.f32 %v970_v58, %v808_v46  ;;  %v1470_v62 = vpop.f32.mrb[10].mxu0  ;;  %v1129_v63 = vpack.c.bf16 %v1114_v55, %v1113_v54 }
 0x1e6   : > { %v1103_v0 = vadd.f32 %v1050_v36, %v979_v57  ;;  %v982_v1 = vadd.f32 %v1470_v62, %v1450_v48  ;;  %v973_v2 = vpop.f32.mrb[11].mxu0 }
 0x1e7   : > { %v1453_v3 = vpop.f32.mrb[12].mxu1  ;;  %v1101_v4 = vadd.f32 %v1040_v28, %v971_v61  ;;  %v974_v5 = vadd.f32 %v973_v2, %v811_v50  ;;  %1479 = vmatprep.subr.bf16.mxu1 %v1129_v63  ;;  %v1080_v28 = vpop.permute.xlu0 %1079 }
 0x1e8   : > { %v824_v6 = vpop.f32.mrb[13].mxu1  ;;  %v1104_v7 = vadd.f32 %v1055_v43, %v982_v1  ;;  %1480 = vmatpush3.bf16.msra.mxu1 %v1129_v63  ;;  %v1119_v12 = vmax.f32 %v1103_v0, 0.0  ;;  %v1580_v63 = vld [vmem:[%s2008_s9 + $0x8] sm:$0xff]   ;;  %v1145_v1 = vpop.permute.xlu1 %1144 }
 0x1e9   : > { %v1454_v8 = vpop.f32.mrb[14].mxu1  ;;  %v1102_v10 = vadd.f32 %v1045_v31, %v974_v5  ;;  %1481 = vmatprep.subr.bf16.mxu1 %v1130_v59  ;;  %v1117_v15 = vmax.f32 %v1101_v4, 0.0 }
 0x1ea   : > { %v827_v11 = vpop.f32.mrb[15].mxu1  ;;  %v1120_v13 = vmax.f32 %v1104_v7, 0.0 }
 0x1eb   : > { %v1118_v16 = vmax.f32 %v1102_v10, 0.0  ;;  %v1473_v17 = vpop.f32.mrb[12].mxu0  ;;  %v1090_v45 = vpop.permute.xlu0 %1089 }
 0x1ec   : > { %v995_v18 = vadd.f32 %v1473_v17, %v1453_v3  ;;  %v986_v19 = vpop.f32.mrb[13].mxu0  ;;  %1482 = vmatpush3.bf16.msra.mxu1 %v1130_v59  ;;  %v1132_v20 = vpack.c.bf16 %v1120_v13, %v1119_v12  ;;  %v1155_v3 = vpop.permute.xlu1 %1154 }
 0x1ed   : > { %v987_v21 = vadd.f32 %v986_v19, %v824_v6  ;;  %v1474_v22 = vpop.f32.mrb[14].mxu0  ;;  %v1131_v23 = vpack.c.bf16 %v1118_v16, %v1117_v15 }
 0x1ee   : > { %v1107_v24 = vadd.f32 %v1070_v9, %v995_v18  ;;  %v998_v25 = vadd.f32 %v1474_v22, %v1454_v8  ;;  %v989_v26 = vpop.f32.mrb[15].mxu0 }
 0x1ef   : > { %v1457_v27 = vpop.f32.mrb[16].mxu1  ;;  %v1105_v29 = vadd.f32 %v1060_v53, %v987_v21  ;;  %v990_v30 = vadd.f32 %v989_v26, %v827_v11  ;;  %1483 = vmatprep.subr.bf16.mxu1 %v1131_v23  ;;  %v1140_v0 = vpop.permute.xlu0 %1139  ;;  %v1260_v26 = vlaneseq }
 0x1f0   : > { %v840_v31 = vpop.f32.mrb[17].mxu1  ;;  %v1108_v32 = vadd.f32 %v1075_v14, %v998_v25  ;;  %1484 = vmatpush3.bf16.msra.mxu1 %v1131_v23  ;;  %v1123_v37 = vmax.f32 %v1107_v24, 0.0  ;;  %v1230_v14 = vpop.permute.xlu1 %1229 }
 0x1f1   : > { %v1458_v33 = vpop.f32.mrb[18].mxu1  ;;  %v1106_v35 = vadd.f32 %v1065_v60, %v990_v30  ;;  %1485 = vmatprep.subr.bf16.mxu1 %v1132_v20  ;;  %v1121_v39 = vmax.f32 %v1105_v29, 0.0  ;;  %v1261_v29 = vshrl.u32 %v1260_v26, 7 }
 0x1f2   : > { %v843_v36 = vpop.f32.mrb[19].mxu1  ;;  %v1124_v38 = vmax.f32 %v1108_v32, 0.0 }
 0x1f3   : > { %v1122_v40 = vmax.f32 %v1106_v35, 0.0  ;;  %v1477_v41 = vpop.f32.mrb[16].mxu0  ;;  %v1150_v2 = vpop.permute.xlu0 %1149  ;;  %v1262_v32 = vsub.s32 0, %v1261_v29 }
 0x1f4   : > { %v1011_v42 = vadd.f32 %v1477_v41, %v1457_v27  ;;  %v1002_v43 = vpop.f32.mrb[17].mxu0  ;;  %1486 = vmatpush3.bf16.msra.mxu1 %v1132_v20  ;;  %v1134_v44 = vpack.c.bf16 %v1124_v38, %v1123_v37  ;;  %v1240_v23 = vpop.permute.xlu1 %1239 }
 0x1f5   : > { %v1003_v46 = vadd.f32 %v1002_v43, %v840_v31  ;;  %v1478_v47 = vpop.f32.mrb[18].mxu0  ;;  %v1133_v48 = vpack.c.bf16 %v1122_v40, %v1121_v39 }
 0x1f6   : > { %v1111_v49 = vadd.f32 %v1090_v45, %v1011_v42  ;;  %v1014_v50 = vadd.f32 %v1478_v47, %v1458_v33  ;;  %v1005_v51 = vpop.f32.mrb[19].mxu0 }
 0x1f7   : > { %v1109_v53 = vadd.f32 %v1080_v28, %v1003_v46  ;;  %v1006_v54 = vadd.f32 %v1005_v51, %v843_v36  ;;  %1487 = vmatprep.subr.bf16.mxu1 %v1133_v48  ;;  %v1225_v9 = vpop.permute.xlu0 %1224 }
 0x1f8   : > { %v1112_v55 = vadd.f32 %v1095_v52, %v1014_v50  ;;  %1488 = vmatpush3.bf16.msra.mxu1 %v1133_v48  ;;  %v1127_v57 = vmax.f32 %v1111_v49, 0.0 }
 0x1f9   : > { %v1110_v56 = vadd.f32 %v1085_v34, %v1006_v54  ;;  %1489 = vmatprep.subr.bf16.mxu1 %v1134_v44  ;;  %v1125_v59 = vmax.f32 %v1109_v53, 0.0 }
 0x1fa   : > { %v1128_v58 = vmax.f32 %v1112_v55, 0.0 }
 0x1fb   : > { %v1126_v60 = vmax.f32 %v1110_v56, 0.0  ;;  %v1235_v20 = vpop.permute.xlu0 %1234 }
 0x1fc   : > { %1490 = vmatpush3.bf16.msra.mxu1 %v1134_v44  ;;  %v1136_v61 = vpack.c.bf16 %v1128_v58, %v1127_v57 }
 0x1fd   : > { %v1135_v62 = vpack.c.bf16 %v1126_v60, %v1125_v59 }
 0x1ff   : > { %1491 = vmatprep.subr.bf16.mxu1 %v1135_v62  ;;  %v1258_v34 = vpop.permute.xlu0 %1257 }
 0x200   : > { %1492 = vmatpush3.bf16.msra.mxu1 %v1135_v62  ;;  %v1263_v36 = vrot.slane %v1258_v34, %v1262_v32 }
 0x201   : > { %1493 = vmatprep.subr.bf16.mxu1 %v1136_v61 }
 0x204   : > { %1494 = vmatpush3.bf16.msra.mxu1 %v1136_v61 }
 0x207   : > { %1496 = vmatmul.mubr.bf16.vlgmr.msra.gmra.mrb[20].mxu1 %v1580_v63 }
 0x2da   : > { %v1497_v4 = vpop.f32.mrb[20].mxu1 }
 0x2db   : > { %v1203_v5 = vpop.f32.mrb[21].mxu1  ;;  %v1212_v6 = vadd.f32 %v1497_v4, %v1150_v2 }
 0x2dc   : > { %v1204_v7 = vadd.f32 %v1203_v5, %v1140_v0  ;;  %v1498_v8 = vpop.f32.mrb[22].mxu1 }
 0x2dd   : > { %v1206_v10 = vpop.f32.mrb[23].mxu1  ;;  %v1215_v12 = vadd.f32 %v1498_v8, %v1155_v3  ;;  %v1220_v15 = vmax.f32 %v1212_v6, 0.0 }
 0x2de   : > { %v1218_v11 = vmax.f32 %v1204_v7, 0.0  ;;  %v1207_v13 = vadd.f32 %v1206_v10, %v1145_v1 }
 0x2df   : > { %v1221_v18 = vmax.f32 %v1215_v12, 0.0  ;;  %v1244_v21 = vmul.f32 %v1235_v20, %v1220_v15 }
 0x2e0   : > { %v1219_v16 = vmax.f32 %v1207_v13, 0.0  ;;  %v1242_v17 = vmul.f32 %v1225_v9, %v1218_v11 }
 0x2e1   : > { %v1245_v24 = vmul.f32 %v1240_v23, %v1221_v18 }
 0x2e2   : > { %v1243_v19 = vmul.f32 %v1230_v14, %v1219_v16 }
 0x2e4   : > { %v1246_v22 = vadd.f32 %v1243_v19, %v1242_v17 }
 0x2e6   : > { %v1247_v25 = vadd.f32 %v1246_v22, %v1244_v21 }
 0x2e8   : > { %v1248_v27 = vadd.f32 %v1247_v25, %v1245_v24 }
 0x2ea   : > { %v1249_v28 = vrot.slane %v1248_v27, 4 }
 0x2ec   : > { %v1250_v30 = vadd.f32 %v1249_v28, %v1248_v27 }
 0x2ee   : > { %v1251_v31 = vrot.slane %v1250_v30, 2 }
 0x2f0   : > { %v1252_v33 = vadd.f32 %v1251_v31, %v1250_v30 }
 0x2f2   : > { %v1253_v35 = vrot.slane %v1252_v33, 1 }
 0x2f4   : > { %v1254_v37 = vadd.f32 %v1253_v35, %v1252_v33 }
 0x2f6   : > { %v1264_v38 = vadd.f32 %v1263_v36, %v1254_v37 }
 0x2f8   : > { %1265 = vst [vmem:[%s445_s22] sm:$0x1] %v1264_v38 }
 0x2f9   : > { %1594 = shalt.err (!%p1591_p3)
}
 0x2fa   : > { %s1595_s18 = scalar_lea.hbm %s1957_s29, 16  ;;  %s1599_s17 = scalar_lea.hbm %s2012_s13, 32 }
 0x2fb   : > { %p1596_p4 = scmp.ne.s32.totalorder %s1957_s29, %s1595_s18  ;;  %p1600_p9 = scmp.lt.u32.totalorder %s1957_s29, %s2012_s13 }
 0x2fc   : > { %p1601_p10 = scmp.lt.u32.totalorder %s1599_s17, %s1595_s18  ;;  %p1603_p12 = scmp.lt.u32.totalorder %s1595_s18, %s1957_s29 }
 0x2fd   : > { %p1597_p7 = pnand %p1596_p4, %p1760_p5 }
 0x2fe   : > { %p1602_p11 = por %p1601_p10, %p1600_p9 }
 0x2ff   : > { %p1598_p8 = pneg %p1597_p7 }
 0x300   : > { %p1604_p13 = por %p1603_p12, %p1602_p11 }
 0x302   : > { %p1605_p0 = pnand %p1604_p13, %p1598_p8 }
 0x304   : > { %1608 = shalt.err (!%p1605_p0)
}
 0x305   : > { %1516 = dma.vmem_to_hbm [thread:$0]  (%p1760_p5), %s1959_s23, 16, %s1957_s29, %s1267_s15  }
 0x306 PF: > { %s2025_s26 = sld [smem:[#allocation6_spill]]  ;;  %p1522_p1 = scmp.ge.s32.totalorder %s1643_s30, 2 }
 0x308   : > { %p1519_p2 = pnand %p1522_p1, %p1764_p6 }
 0x30c   : > { %s1291_s24 = sand.u32 1, %s2025_s26  }
 0x30d   : > { %s1292_s12 = scalar_lea.sflag [#allocation4], %s1291_s24 }
 0x30e   : > { %1626 = dma.done.wait (!%p1519_p2), %s1292_s12, 16  }
 0x30f   : > { %1628 = vsyncadd (!%p1519_p2), %s1292_s12, 4294967280  ;;  %s2027_s30 = sld [smem:[#allocation8_spill]]  ;;  %s2028_s25 = sld [smem:[#allocation7_spill]] }
 0x310   : > { %s2029_s29 = sld [smem:[#allocation9_spill]]  ;;  %s2030_s27 = smov %s1635_s28 }
 0x315   : > { %p25_p3 = scmp.ge.s32.totalorder %s2027_s30, 4   ;;  %s2031_s28 = smov %s2028_s25 }
 0x317   :  { %27 = sbr.rel (!%p25_p3) target bundleno = 6 (0x6), region = 110 }
 0x31e   :  { %1296 = vsyncpa [#allocation4], 1 }
 0x31f   :  { %1298 = vsyncpa [#allocation4 + $0x1], 1 }

</bundles_post_ra>
